<compile_context>
chip_gen: v6e
topology: v6e:2x2x1
jax: 0.10.0
libtpu: 0.0.40
codegen_flags: <defaults>
</compile_context>

<pallas_src>
import functools

import jax
import jax.numpy as jnp
from jax import lax
from jax.experimental import pallas as pl
from jax.experimental.pallas import tpu as pltpu


# ----------------------- Wong-Wang model constants -------------------------
_A = 270.0          # Hz / nA
_B = 108.0          # Hz
_D = 0.154          # s
_GAMMA = 0.641
_TAU_S_MS = 100.0   # synaptic time constant (ms)
_J_SAME = 0.2609    # self excitation (nA)
_J_DIFF = 0.0497    # cross inhibition (nA)
_I0 = 0.3255        # background current (nA)
_J_EXT = 0.00052    # external input gain (nA per unit input)
_THRESH_HZ = 15.0   # firing-rate decision threshold
_S_INIT = 0.1       # initial gating variable
_LINEAR_SCALE = 0.2  # the folded nn.Linear: weight = 0.2*I, bias = 0


def _ww_kernel(logits_ref, out_ref, *, dt, n_steps, batch, check_every,
               compute_dtype):
    """Fused: 0.2*|logits| + Wong-Wang Euler integration + decision-time scan.

    logits_ref: (N, B_BLOCK)  -- classes on sublanes, batch on lanes.
    out_ref:    (1, B_BLOCK)  -- lane-dense decision times (ms), f32.
    """
    xt = logits_ref[...].astype(compute_dtype)         # (N, B)
    n_cls, b_blk = xt.shape
    use_bf16 = compute_dtype == jnp.bfloat16

    # -------- Python-time folded constants (pure scalars, no VALU cost) -----
    # Folded nn.Linear + folded external drive:
    #   ax_base = A * (I0 + J_ext * 0.2 * |logits|) - B
    ax_base = (_A * _I0 - _B) + (_A * _J_EXT * _LINEAR_SCALE) * jnp.abs(xt)
    ac_self = _A * (_J_SAME + _J_DIFF)    # pre-scaled self coupling
    ac_inh = _A * _J_DIFF                 # pre-scaled cross inhibition
    c_leak = dt / _TAU_S_MS               # dt / tau
    c_gain = _GAMMA * dt / 1000.0         # gamma * dt (Hz -> per-ms)
    inv_d = 1.0 / _D
    dt_f = jnp.float32(dt)

    # Padded batch lanes start "decided" so they never block the early exit.
    lane = (lax.broadcasted_iota(jnp.int32, (1, b_blk), 1)
            + pl.program_id(0) * b_blk)
    valid = lane < batch                                 # (1, B) bool

    S0 = jnp.full((n_cls, b_blk), _S_INIT, compute_dtype)
    dec0 = jnp.where(valid, jnp.float32(-1.0), jnp.float32(0.0))  # -1 = undecided

    n_blocks = -(-int(n_steps) // int(check_every))
    need_guard = (int(n_steps) % int(check_every)) != 0  # False for 200/8

    def euler_step(t, carry):
        S, dec = carry
        total = jnp.sum(S, axis=0, keepdims=True)                 # (1, B)  XLU
        ax = ac_self * S - ac_inh * total + ax_base                # (N, B)
        denom = 1.0 - jnp.exp(-_D * ax)                            # EUP exp
        if use_bf16:
            ratio = ax / denom
        else:
            ratio = ax * pl.reciprocal(denom, approx=True)         # EUP slot
        # limit ax -> 0 of ax / (1 - exp(-d*ax)) is 1/d
        H = jnp.where(jnp.abs(denom) < 1e-6, inv_d, ratio)         # Hz
        gH = c_gain * H
        S_new = S + (gH - S * (gH + c_leak))                       # strength-reduced dS
        crossed = jnp.max(H, axis=0, keepdims=True) >= _THRESH_HZ  # (1, B)  XLU
        if need_guard:
            crossed = jnp.logical_and(crossed, t < n_steps)
        t_ms = (t + 1).astype(jnp.float32) * dt_f
        dec_new = jnp.where((dec < 0.0) & crossed, t_ms, dec)
        return S_new, dec_new

    def cond(carry):
        blk, _, dec = carry
        # any valid lane still undecided AND blocks remaining
        return jnp.logical_and(blk < n_blocks, jnp.min(dec) < 0.0)

    def body(carry):
        blk, S, dec = carry
        base = blk * check_every

        def inner(i, c):
            return euler_step(base + i, c)

        S, dec = lax.fori_loop(0, check_every, inner, (S, dec), unroll=True)
        return blk + jnp.int32(1), S, dec

    _, _, dec = lax.while_loop(cond, body, (jnp.int32(0), S0, dec0))

    # never crossed -> max simulation time
    dec = jnp.where(dec < 0.0, jnp.float32(n_steps) * dt_f, dec)
    out_ref[...] = dec


def _default_compute_dtype():
    """bf16 state/compute on v6e/v7x (bf16 VPU/EUP); f32 on v5e and older."""
    try:
        dk = jax.devices()[0].device_kind.lower()
    except Exception:
        return jnp.float32
    if ("v6" in dk) or ("v7" in dk):
        return jnp.bfloat16
    return jnp.float32


def _choose_blocking(batch, b_block):
    """Pick (blk, padded_b): minimize padded lanes, prefer >=2 blocks
    (megacore on v7x), then the largest block (fewest grid steps)."""
    lane = 128
    padded128 = max(lane, -(-batch // lane) * lane)
    best = None
    for blk in (128, 256, 512):
        if blk > b_block:
            continue
        padded = -(-padded128 // blk) * blk
        nblk = padded // blk
        waste = padded - batch
        key = (waste, 0 if nblk >= 2 else 1, -blk)
        if best is None or key < best[0]:
            best = (key, blk, padded)
    _, blk, padded = best
    return blk, padded


def ww_multiclass_wrapper_forward(model_name, logits, labels, *,
                                  n_classes=10, dt=10, n_steps=200,
                                  check_every=8, b_block=512,
                                  compute_dtype=None):
    """Pallas equivalent of WW_multiclass_wrapper.forward.

    `model_name` and `labels` are accepted for signature parity but unused,
    exactly as in the PyTorch forward.
    Returns per-sample decision times (ms), shape (batch,), float32.
    """
    del model_name, labels  # unused in the reference forward
    B = logits.shape[0]
    assert logits.shape[1] == n_classes
    if compute_dtype is None:
        compute_dtype = _default_compute_dtype()

    blk, padded_b = _choose_blocking(int(B), int(b_block))
    num_blocks = padded_b // blk

    # Layout plumbing only (no compute hoisted out of the kernel): transpose to
    # classes-on-sublanes / batch-on-lanes and zero-pad the batch lanes.
    logits_t = jnp.zeros((n_classes, padded_b), jnp.float32)
    logits_t = logits_t.at[:, :B].set(logits.astype(jnp.float32).T)

    kernel = functools.partial(
        _ww_kernel, dt=float(dt), n_steps=int(n_steps),
        batch=int(B), check_every=int(check_every),
        compute_dtype=compute_dtype)

    out = pl.pallas_call(
        kernel,
        out_shape=jax.ShapeDtypeStruct((1, padded_b), jnp.float32),
        grid=(num_blocks,),
        in_specs=[pl.BlockSpec((n_classes, blk), lambda i: (0, i))],
        out_specs=pl.BlockSpec((1, blk), lambda i: (0, i)),
        compiler_params=pltpu.CompilerParams(
            dimension_semantics=("parallel",)),
    )(logits_t)
    return out[0, :B]


if __name__ == "__main__":
    key = jax.random.PRNGKey(0)
    k1, k2 = jax.random.split(key)
    batch, n_classes = 2, 10
    logits = jax.random.normal(k1, (batch, n_classes), dtype=jnp.float32) * 3.0
    labels = jax.random.randint(k2, (batch,), 0, n_classes)

    decision_times = ww_multiclass_wrapper_forward(
        "vgg_synthetic", logits, labels, n_classes=n_classes, dt=10, n_steps=200)
    decision_times = jax.block_until_ready(decision_times)
    assert decision_times.shape == (batch,)
    assert bool(jnp.all(jnp.isfinite(decision_times)))
    assert bool(jnp.all(decision_times > 0.0))
    print("KERNEL_OK")
</pallas_src>

<mosaic_0001>
module attributes {stable_mosaic.version = 11 : i64} {
  func.func @_ww_kernel(%arg0: i32, %arg1: memref<10x128xf32, #tpu.memory_space<vmem>>, %arg2: memref<1x128xf32, #tpu.memory_space<vmem>>) attributes {dimension_semantics = [#tpu.dimension_semantics<parallel>], iteration_bounds = array<i64: 1>, scalar_prefetch = 0 : i64, scratch_operands = 0 : i64, tpu.core_type = #tpu.core_type<tc>, window_params = [{transform_indices = @transform_0, window_bounds = array<i64: 10, 128>}, {transform_indices = @transform_1, window_bounds = array<i64: 1, 128>}]} {
    %c0 = arith.constant 0 : index
    %c0_0 = arith.constant 0 : index
    %0 = vector.load %arg1[%c0, %c0_0] : memref<10x128xf32, #tpu.memory_space<vmem>>, vector<10x128xf32>
    %1 = math.absf %0 : vector<10x128xf32>
    %cst = arith.constant 2.808000e-02 : f32
    %2 = vector.broadcast %cst : f32 to vector<10x128xf32>
    %3 = arith.mulf %2, %1 : vector<10x128xf32>
    %cst_1 = arith.constant -2.011500e+01 : f32
    %4 = vector.broadcast %cst_1 : f32 to vector<10x128xf32>
    %5 = arith.addf %4, %3 : vector<10x128xf32>
    %6 = tpu.iota {dimensions = array<i32: 1>} : vector<1x128xi32>
    %c128_i32 = arith.constant 128 : i32
    %7 = arith.muli %arg0, %c128_i32 : i32
    %8 = vector.broadcast %7 : i32 to vector<1x128xi32>
    %9 = arith.addi %6, %8 : vector<1x128xi32>
    %c2_i32 = arith.constant 2 : i32
    %10 = vector.broadcast %c2_i32 : i32 to vector<1x128xi32>
    %11 = arith.cmpi slt, %9, %10 : vector<1x128xi32>
    %cst_2 = arith.constant 1.000000e-01 : f32
    %12 = vector.broadcast %cst_2 : f32 to vector<10x128xf32>
    %cst_3 = arith.constant -1.000000e+00 : f32
    %cst_4 = arith.constant 0.000000e+00 : f32
    %13 = vector.broadcast %cst_3 : f32 to vector<1x128xf32>
    %14 = vector.broadcast %cst_4 : f32 to vector<1x128xf32>
    %15 = arith.select %11, %13, %14 : vector<1x128xi1>, vector<1x128xf32>
    %cst_5 = arith.constant 1.000000e+01 : f32
    %c0_i32 = arith.constant 0 : i32
    %16:3 = scf.while (%arg3 = %c0_i32, %arg4 = %12, %arg5 = %15) : (i32, vector<10x128xf32>, vector<1x128xf32>) -> (i32, vector<10x128xf32>, vector<1x128xf32>) {
      %c25_i32 = arith.constant 25 : i32
      %23 = arith.cmpi slt, %arg3, %c25_i32 : i32
      %24 = vector.shape_cast %arg5 : vector<1x128xf32> to vector<1x1x128xf32>
      %cst_11 = arith.constant dense<0x7F800000> : vector<1xf32>
      %25 = vector.multi_reduction <minimumf>, %24, %cst_11 [1, 2] : vector<1x1x128xf32> to vector<1xf32>
      %26 = vector.shape_cast %25 : vector<1xf32> to vector<1x1x1xf32>
      %27 = vector.extract %26[0, 0, 0] : f32 from vector<1x1x1xf32>
      %cst_12 = arith.constant 0.000000e+00 : f32
      %28 = arith.cmpf olt, %27, %cst_12 : f32
      %29 = arith.andi %23, %28 : i1
      scf.condition(%29) %arg3, %arg4, %arg5 : i32, vector<10x128xf32>, vector<1x128xf32>
    } do {
    ^bb0(%arg3: i32, %arg4: vector<10x128xf32>, %arg5: vector<1x128xf32>):
      %c8_i32 = arith.constant 8 : i32
      %23 = arith.muli %arg3, %c8_i32 : i32
      %c0_i32_11 = arith.constant 0 : i32
      %24 = arith.addi %23, %c0_i32_11 : i32
      %cst_12 = arith.constant dense<0.000000e+00> : vector<128xf32>
      %25 = vector.multi_reduction <add>, %arg4, %cst_12 [0] : vector<10x128xf32> to vector<128xf32>
      %26 = vector.shape_cast %25 : vector<128xf32> to vector<1x128xf32>
      %cst_13 = arith.constant 8.386200e+01 : f32
      %27 = vector.broadcast %cst_13 : f32 to vector<10x128xf32>
      %28 = arith.mulf %27, %arg4 : vector<10x128xf32>
      %cst_14 = arith.constant 1.341900e+01 : f32
      %29 = vector.broadcast %cst_14 : f32 to vector<1x128xf32>
      %30 = arith.mulf %29, %26 : vector<1x128xf32>
      %31 = vector.broadcast %30 : vector<1x128xf32> to vector<10x128xf32>
      %32 = arith.subf %28, %31 : vector<10x128xf32>
      %33 = arith.addf %32, %5 : vector<10x128xf32>
      %cst_15 = arith.constant -1.540000e-01 : f32
      %34 = vector.broadcast %cst_15 : f32 to vector<10x128xf32>
      %35 = arith.mulf %34, %33 : vector<10x128xf32>
      %36 = math.exp %35 : vector<10x128xf32>
      %cst_16 = arith.constant 1.000000e+00 : f32
      %37 = vector.broadcast %cst_16 : f32 to vector<10x128xf32>
      %38 = arith.subf %37, %36 : vector<10x128xf32>
      %39 = tpu.reciprocal %38 {approx = true} : vector<10x128xf32> -> vector<10x128xf32>
      %40 = arith.mulf %33, %39 : vector<10x128xf32>
      %41 = math.absf %38 : vector<10x128xf32>
      %cst_17 = arith.constant 9.99999997E-7 : f32
      %42 = vector.broadcast %cst_17 : f32 to vector<10x128xf32>
      %43 = arith.cmpf olt, %41, %42 : vector<10x128xf32>
      %cst_18 = arith.constant 6.49350643 : f32
      %44 = vector.broadcast %cst_18 : f32 to vector<10x128xf32>
      %45 = arith.select %43, %44, %40 : vector<10x128xi1>, vector<10x128xf32>
      %cst_19 = arith.constant 6.410000e-03 : f32
      %46 = vector.broadcast %cst_19 : f32 to vector<10x128xf32>
      %47 = arith.mulf %46, %45 : vector<10x128xf32>
      %cst_20 = arith.constant 1.000000e-01 : f32
      %48 = vector.broadcast %cst_20 : f32 to vector<10x128xf32>
      %49 = arith.addf %47, %48 : vector<10x128xf32>
      %50 = arith.mulf %arg4, %49 : vector<10x128xf32>
      %51 = arith.subf %47, %50 : vector<10x128xf32>
      %52 = arith.addf %arg4, %51 : vector<10x128xf32>
      %cst_21 = arith.constant dense<0xFF800000> : vector<128xf32>
      %53 = vector.multi_reduction <maximumf>, %45, %cst_21 [0] : vector<10x128xf32> to vector<128xf32>
      %54 = vector.shape_cast %53 : vector<128xf32> to vector<1x128xf32>
      %cst_22 = arith.constant 1.500000e+01 : f32
      %55 = vector.broadcast %cst_22 : f32 to vector<1x128xf32>
      %56 = arith.cmpf oge, %54, %55 : vector<1x128xf32>
      %c1_i32 = arith.constant 1 : i32
      %57 = arith.addi %24, %c1_i32 : i32
      %58 = arith.sitofp %57 : i32 to f32
      %59 = arith.mulf %58, %cst_5 : f32
      %cst_23 = arith.constant 0.000000e+00 : f32
      %60 = vector.broadcast %cst_23 : f32 to vector<1x128xf32>
      %61 = arith.cmpf olt, %arg5, %60 : vector<1x128xf32>
      %62 = arith.andi %61, %56 : vector<1x128xi1>
      %63 = vector.broadcast %59 : f32 to vector<1x128xf32>
      %64 = arith.select %62, %63, %arg5 : vector<1x128xi1>, vector<1x128xf32>
      %c1_i32_24 = arith.constant 1 : i32
      %65 = arith.addi %23, %c1_i32_24 : i32
      %cst_25 = arith.constant dense<0.000000e+00> : vector<128xf32>
      %66 = vector.multi_reduction <add>, %52, %cst_25 [0] : vector<10x128xf32> to vector<128xf32>
      %67 = vector.shape_cast %66 : vector<128xf32> to vector<1x128xf32>
      %cst_26 = arith.constant 8.386200e+01 : f32
      %68 = vector.broadcast %cst_26 : f32 to vector<10x128xf32>
      %69 = arith.mulf %68, %52 : vector<10x128xf32>
      %cst_27 = arith.constant 1.341900e+01 : f32
      %70 = vector.broadcast %cst_27 : f32 to vector<1x128xf32>
      %71 = arith.mulf %70, %67 : vector<1x128xf32>
      %72 = vector.broadcast %71 : vector<1x128xf32> to vector<10x128xf32>
      %73 = arith.subf %69, %72 : vector<10x128xf32>
      %74 = arith.addf %73, %5 : vector<10x128xf32>
      %cst_28 = arith.constant -1.540000e-01 : f32
      %75 = vector.broadcast %cst_28 : f32 to vector<10x128xf32>
      %76 = arith.mulf %75, %74 : vector<10x128xf32>
      %77 = math.exp %76 : vector<10x128xf32>
      %cst_29 = arith.constant 1.000000e+00 : f32
      %78 = vector.broadcast %cst_29 : f32 to vector<10x128xf32>
      %79 = arith.subf %78, %77 : vector<10x128xf32>
      %80 = tpu.reciprocal %79 {approx = true} : vector<10x128xf32> -> vector<10x128xf32>
      %81 = arith.mulf %74, %80 : vector<10x128xf32>
      %82 = math.absf %79 : vector<10x128xf32>
      %cst_30 = arith.constant 9.99999997E-7 : f32
      %83 = vector.broadcast %cst_30 : f32 to vector<10x128xf32>
      %84 = arith.cmpf olt, %82, %83 : vector<10x128xf32>
      %cst_31 = arith.constant 6.49350643 : f32
      %85 = vector.broadcast %cst_31 : f32 to vector<10x128xf32>
      %86 = arith.select %84, %85, %81 : vector<10x128xi1>, vector<10x128xf32>
      %cst_32 = arith.constant 6.410000e-03 : f32
      %87 = vector.broadcast %cst_32 : f32 to vector<10x128xf32>
      %88 = arith.mulf %87, %86 : vector<10x128xf32>
      %cst_33 = arith.constant 1.000000e-01 : f32
      %89 = vector.broadcast %cst_33 : f32 to vector<10x128xf32>
      %90 = arith.addf %88, %89 : vector<10x128xf32>
      %91 = arith.mulf %52, %90 : vector<10x128xf32>
      %92 = arith.subf %88, %91 : vector<10x128xf32>
      %93 = arith.addf %52, %92 : vector<10x128xf32>
      %cst_34 = arith.constant dense<0xFF800000> : vector<128xf32>
      %94 = vector.multi_reduction <maximumf>, %86, %cst_34 [0] : vector<10x128xf32> to vector<128xf32>
      %95 = vector.shape_cast %94 : vector<128xf32> to vector<1x128xf32>
      %cst_35 = arith.constant 1.500000e+01 : f32
      %96 = vector.broadcast %cst_35 : f32 to vector<1x128xf32>
      %97 = arith.cmpf oge, %95, %96 : vector<1x128xf32>
      %c1_i32_36 = arith.constant 1 : i32
      %98 = arith.addi %65, %c1_i32_36 : i32
      %99 = arith.sitofp %98 : i32 to f32
      %100 = arith.mulf %99, %cst_5 : f32
      %cst_37 = arith.constant 0.000000e+00 : f32
      %101 = vector.broadcast %cst_37 : f32 to vector<1x128xf32>
      %102 = arith.cmpf olt, %64, %101 : vector<1x128xf32>
      %103 = arith.andi %102, %97 : vector<1x128xi1>
      %104 = vector.broadcast %100 : f32 to vector<1x128xf32>
      %105 = arith.select %103, %104, %64 : vector<1x128xi1>, vector<1x128xf32>
      %c2_i32_38 = arith.constant 2 : i32
      %106 = arith.addi %23, %c2_i32_38 : i32
      %cst_39 = arith.constant dense<0.000000e+00> : vector<128xf32>
      %107 = vector.multi_reduction <add>, %93, %cst_39 [0] : vector<10x128xf32> to vector<128xf32>
      %108 = vector.shape_cast %107 : vector<128xf32> to vector<1x128xf32>
      %cst_40 = arith.constant 8.386200e+01 : f32
      %109 = vector.broadcast %cst_40 : f32 to vector<10x128xf32>
      %110 = arith.mulf %109, %93 : vector<10x128xf32>
      %cst_41 = arith.constant 1.341900e+01 : f32
      %111 = vector.broadcast %cst_41 : f32 to vector<1x128xf32>
      %112 = arith.mulf %111, %108 : vector<1x128xf32>
      %113 = vector.broadcast %112 : vector<1x128xf32> to vector<10x128xf32>
      %114 = arith.subf %110, %113 : vector<10x128xf32>
      %115 = arith.addf %114, %5 : vector<10x128xf32>
      %cst_42 = arith.constant -1.540000e-01 : f32
      %116 = vector.broadcast %cst_42 : f32 to vector<10x128xf32>
      %117 = arith.mulf %116, %115 : vector<10x128xf32>
      %118 = math.exp %117 : vector<10x128xf32>
      %cst_43 = arith.constant 1.000000e+00 : f32
      %119 = vector.broadcast %cst_43 : f32 to vector<10x128xf32>
      %120 = arith.subf %119, %118 : vector<10x128xf32>
      %121 = tpu.reciprocal %120 {approx = true} : vector<10x128xf32> -> vector<10x128xf32>
      %122 = arith.mulf %115, %121 : vector<10x128xf32>
      %123 = math.absf %120 : vector<10x128xf32>
      %cst_44 = arith.constant 9.99999997E-7 : f32
      %124 = vector.broadcast %cst_44 : f32 to vector<10x128xf32>
      %125 = arith.cmpf olt, %123, %124 : vector<10x128xf32>
      %cst_45 = arith.constant 6.49350643 : f32
      %126 = vector.broadcast %cst_45 : f32 to vector<10x128xf32>
      %127 = arith.select %125, %126, %122 : vector<10x128xi1>, vector<10x128xf32>
      %cst_46 = arith.constant 6.410000e-03 : f32
      %128 = vector.broadcast %cst_46 : f32 to vector<10x128xf32>
      %129 = arith.mulf %128, %127 : vector<10x128xf32>
      %cst_47 = arith.constant 1.000000e-01 : f32
      %130 = vector.broadcast %cst_47 : f32 to vector<10x128xf32>
      %131 = arith.addf %129, %130 : vector<10x128xf32>
      %132 = arith.mulf %93, %131 : vector<10x128xf32>
      %133 = arith.subf %129, %132 : vector<10x128xf32>
      %134 = arith.addf %93, %133 : vector<10x128xf32>
      %cst_48 = arith.constant dense<0xFF800000> : vector<128xf32>
      %135 = vector.multi_reduction <maximumf>, %127, %cst_48 [0] : vector<10x128xf32> to vector<128xf32>
      %136 = vector.shape_cast %135 : vector<128xf32> to vector<1x128xf32>
      %cst_49 = arith.constant 1.500000e+01 : f32
      %137 = vector.broadcast %cst_49 : f32 to vector<1x128xf32>
      %138 = arith.cmpf oge, %136, %137 : vector<1x128xf32>
      %c1_i32_50 = arith.constant 1 : i32
      %139 = arith.addi %106, %c1_i32_50 : i32
      %140 = arith.sitofp %139 : i32 to f32
      %141 = arith.mulf %140, %cst_5 : f32
      %cst_51 = arith.constant 0.000000e+00 : f32
      %142 = vector.broadcast %cst_51 : f32 to vector<1x128xf32>
      %143 = arith.cmpf olt, %105, %142 : vector<1x128xf32>
      %144 = arith.andi %143, %138 : vector<1x128xi1>
      %145 = vector.broadcast %141 : f32 to vector<1x128xf32>
      %146 = arith.select %144, %145, %105 : vector<1x128xi1>, vector<1x128xf32>
      %c3_i32 = arith.constant 3 : i32
      %147 = arith.addi %23, %c3_i32 : i32
      %cst_52 = arith.constant dense<0.000000e+00> : vector<128xf32>
      %148 = vector.multi_reduction <add>, %134, %cst_52 [0] : vector<10x128xf32> to vector<128xf32>
      %149 = vector.shape_cast %148 : vector<128xf32> to vector<1x128xf32>
      %cst_53 = arith.constant 8.386200e+01 : f32
      %150 = vector.broadcast %cst_53 : f32 to vector<10x128xf32>
      %151 = arith.mulf %150, %134 : vector<10x128xf32>
      %cst_54 = arith.constant 1.341900e+01 : f32
      %152 = vector.broadcast %cst_54 : f32 to vector<1x128xf32>
      %153 = arith.mulf %152, %149 : vector<1x128xf32>
      %154 = vector.broadcast %153 : vector<1x128xf32> to vector<10x128xf32>
      %155 = arith.subf %151, %154 : vector<10x128xf32>
      %156 = arith.addf %155, %5 : vector<10x128xf32>
      %cst_55 = arith.constant -1.540000e-01 : f32
      %157 = vector.broadcast %cst_55 : f32 to vector<10x128xf32>
      %158 = arith.mulf %157, %156 : vector<10x128xf32>
      %159 = math.exp %158 : vector<10x128xf32>
      %cst_56 = arith.constant 1.000000e+00 : f32
      %160 = vector.broadcast %cst_56 : f32 to vector<10x128xf32>
      %161 = arith.subf %160, %159 : vector<10x128xf32>
      %162 = tpu.reciprocal %161 {approx = true} : vector<10x128xf32> -> vector<10x128xf32>
      %163 = arith.mulf %156, %162 : vector<10x128xf32>
      %164 = math.absf %161 : vector<10x128xf32>
      %cst_57 = arith.constant 9.99999997E-7 : f32
      %165 = vector.broadcast %cst_57 : f32 to vector<10x128xf32>
      %166 = arith.cmpf olt, %164, %165 : vector<10x128xf32>
      %cst_58 = arith.constant 6.49350643 : f32
      %167 = vector.broadcast %cst_58 : f32 to vector<10x128xf32>
      %168 = arith.select %166, %167, %163 : vector<10x128xi1>, vector<10x128xf32>
      %cst_59 = arith.constant 6.410000e-03 : f32
      %169 = vector.broadcast %cst_59 : f32 to vector<10x128xf32>
      %170 = arith.mulf %169, %168 : vector<10x128xf32>
      %cst_60 = arith.constant 1.000000e-01 : f32
      %171 = vector.broadcast %cst_60 : f32 to vector<10x128xf32>
      %172 = arith.addf %170, %171 : vector<10x128xf32>
      %173 = arith.mulf %134, %172 : vector<10x128xf32>
      %174 = arith.subf %170, %173 : vector<10x128xf32>
      %175 = arith.addf %134, %174 : vector<10x128xf32>
      %cst_61 = arith.constant dense<0xFF800000> : vector<128xf32>
      %176 = vector.multi_reduction <maximumf>, %168, %cst_61 [0] : vector<10x128xf32> to vector<128xf32>
      %177 = vector.shape_cast %176 : vector<128xf32> to vector<1x128xf32>
      %cst_62 = arith.constant 1.500000e+01 : f32
      %178 = vector.broadcast %cst_62 : f32 to vector<1x128xf32>
      %179 = arith.cmpf oge, %177, %178 : vector<1x128xf32>
      %c1_i32_63 = arith.constant 1 : i32
      %180 = arith.addi %147, %c1_i32_63 : i32
      %181 = arith.sitofp %180 : i32 to f32
      %182 = arith.mulf %181, %cst_5 : f32
      %cst_64 = arith.constant 0.000000e+00 : f32
      %183 = vector.broadcast %cst_64 : f32 to vector<1x128xf32>
      %184 = arith.cmpf olt, %146, %183 : vector<1x128xf32>
      %185 = arith.andi %184, %179 : vector<1x128xi1>
      %186 = vector.broadcast %182 : f32 to vector<1x128xf32>
      %187 = arith.select %185, %186, %146 : vector<1x128xi1>, vector<1x128xf32>
      %c4_i32 = arith.constant 4 : i32
      %188 = arith.addi %23, %c4_i32 : i32
      %cst_65 = arith.constant dense<0.000000e+00> : vector<128xf32>
      %189 = vector.multi_reduction <add>, %175, %cst_65 [0] : vector<10x128xf32> to vector<128xf32>
      %190 = vector.shape_cast %189 : vector<128xf32> to vector<1x128xf32>
      %cst_66 = arith.constant 8.386200e+01 : f32
      %191 = vector.broadcast %cst_66 : f32 to vector<10x128xf32>
      %192 = arith.mulf %191, %175 : vector<10x128xf32>
      %cst_67 = arith.constant 1.341900e+01 : f32
      %193 = vector.broadcast %cst_67 : f32 to vector<1x128xf32>
      %194 = arith.mulf %193, %190 : vector<1x128xf32>
      %195 = vector.broadcast %194 : vector<1x128xf32> to vector<10x128xf32>
      %196 = arith.subf %192, %195 : vector<10x128xf32>
      %197 = arith.addf %196, %5 : vector<10x128xf32>
      %cst_68 = arith.constant -1.540000e-01 : f32
      %198 = vector.broadcast %cst_68 : f32 to vector<10x128xf32>
      %199 = arith.mulf %198, %197 : vector<10x128xf32>
      %200 = math.exp %199 : vector<10x128xf32>
      %cst_69 = arith.constant 1.000000e+00 : f32
      %201 = vector.broadcast %cst_69 : f32 to vector<10x128xf32>
      %202 = arith.subf %201, %200 : vector<10x128xf32>
      %203 = tpu.reciprocal %202 {approx = true} : vector<10x128xf32> -> vector<10x128xf32>
      %204 = arith.mulf %197, %203 : vector<10x128xf32>
      %205 = math.absf %202 : vector<10x128xf32>
      %cst_70 = arith.constant 9.99999997E-7 : f32
      %206 = vector.broadcast %cst_70 : f32 to vector<10x128xf32>
      %207 = arith.cmpf olt, %205, %206 : vector<10x128xf32>
      %cst_71 = arith.constant 6.49350643 : f32
      %208 = vector.broadcast %cst_71 : f32 to vector<10x128xf32>
      %209 = arith.select %207, %208, %204 : vector<10x128xi1>, vector<10x128xf32>
      %cst_72 = arith.constant 6.410000e-03 : f32
      %210 = vector.broadcast %cst_72 : f32 to vector<10x128xf32>
      %211 = arith.mulf %210, %209 : vector<10x128xf32>
      %cst_73 = arith.constant 1.000000e-01 : f32
      %212 = vector.broadcast %cst_73 : f32 to vector<10x128xf32>
      %213 = arith.addf %211, %212 : vector<10x128xf32>
      %214 = arith.mulf %175, %213 : vector<10x128xf32>
      %215 = arith.subf %211, %214 : vector<10x128xf32>
      %216 = arith.addf %175, %215 : vector<10x128xf32>
      %cst_74 = arith.constant dense<0xFF800000> : vector<128xf32>
      %217 = vector.multi_reduction <maximumf>, %209, %cst_74 [0] : vector<10x128xf32> to vector<128xf32>
      %218 = vector.shape_cast %217 : vector<128xf32> to vector<1x128xf32>
      %cst_75 = arith.constant 1.500000e+01 : f32
      %219 = vector.broadcast %cst_75 : f32 to vector<1x128xf32>
      %220 = arith.cmpf oge, %218, %219 : vector<1x128xf32>
      %c1_i32_76 = arith.constant 1 : i32
      %221 = arith.addi %188, %c1_i32_76 : i32
      %222 = arith.sitofp %221 : i32 to f32
      %223 = arith.mulf %222, %cst_5 : f32
      %cst_77 = arith.constant 0.000000e+00 : f32
      %224 = vector.broadcast %cst_77 : f32 to vector<1x128xf32>
      %225 = arith.cmpf olt, %187, %224 : vector<1x128xf32>
      %226 = arith.andi %225, %220 : vector<1x128xi1>
      %227 = vector.broadcast %223 : f32 to vector<1x128xf32>
      %228 = arith.select %226, %227, %187 : vector<1x128xi1>, vector<1x128xf32>
      %c5_i32 = arith.constant 5 : i32
      %229 = arith.addi %23, %c5_i32 : i32
      %cst_78 = arith.constant dense<0.000000e+00> : vector<128xf32>
      %230 = vector.multi_reduction <add>, %216, %cst_78 [0] : vector<10x128xf32> to vector<128xf32>
      %231 = vector.shape_cast %230 : vector<128xf32> to vector<1x128xf32>
      %cst_79 = arith.constant 8.386200e+01 : f32
      %232 = vector.broadcast %cst_79 : f32 to vector<10x128xf32>
      %233 = arith.mulf %232, %216 : vector<10x128xf32>
      %cst_80 = arith.constant 1.341900e+01 : f32
      %234 = vector.broadcast %cst_80 : f32 to vector<1x128xf32>
      %235 = arith.mulf %234, %231 : vector<1x128xf32>
      %236 = vector.broadcast %235 : vector<1x128xf32> to vector<10x128xf32>
      %237 = arith.subf %233, %236 : vector<10x128xf32>
      %238 = arith.addf %237, %5 : vector<10x128xf32>
      %cst_81 = arith.constant -1.540000e-01 : f32
      %239 = vector.broadcast %cst_81 : f32 to vector<10x128xf32>
      %240 = arith.mulf %239, %238 : vector<10x128xf32>
      %241 = math.exp %240 : vector<10x128xf32>
      %cst_82 = arith.constant 1.000000e+00 : f32
      %242 = vector.broadcast %cst_82 : f32 to vector<10x128xf32>
      %243 = arith.subf %242, %241 : vector<10x128xf32>
      %244 = tpu.reciprocal %243 {approx = true} : vector<10x128xf32> -> vector<10x128xf32>
      %245 = arith.mulf %238, %244 : vector<10x128xf32>
      %246 = math.absf %243 : vector<10x128xf32>
      %cst_83 = arith.constant 9.99999997E-7 : f32
      %247 = vector.broadcast %cst_83 : f32 to vector<10x128xf32>
      %248 = arith.cmpf olt, %246, %247 : vector<10x128xf32>
      %cst_84 = arith.constant 6.49350643 : f32
      %249 = vector.broadcast %cst_84 : f32 to vector<10x128xf32>
      %250 = arith.select %248, %249, %245 : vector<10x128xi1>, vector<10x128xf32>
      %cst_85 = arith.constant 6.410000e-03 : f32
      %251 = vector.broadcast %cst_85 : f32 to vector<10x128xf32>
      %252 = arith.mulf %251, %250 : vector<10x128xf32>
      %cst_86 = arith.constant 1.000000e-01 : f32
      %253 = vector.broadcast %cst_86 : f32 to vector<10x128xf32>
      %254 = arith.addf %252, %253 : vector<10x128xf32>
      %255 = arith.mulf %216, %254 : vector<10x128xf32>
      %256 = arith.subf %252, %255 : vector<10x128xf32>
      %257 = arith.addf %216, %256 : vector<10x128xf32>
      %cst_87 = arith.constant dense<0xFF800000> : vector<128xf32>
      %258 = vector.multi_reduction <maximumf>, %250, %cst_87 [0] : vector<10x128xf32> to vector<128xf32>
      %259 = vector.shape_cast %258 : vector<128xf32> to vector<1x128xf32>
      %cst_88 = arith.constant 1.500000e+01 : f32
      %260 = vector.broadcast %cst_88 : f32 to vector<1x128xf32>
      %261 = arith.cmpf oge, %259, %260 : vector<1x128xf32>
      %c1_i32_89 = arith.constant 1 : i32
      %262 = arith.addi %229, %c1_i32_89 : i32
      %263 = arith.sitofp %262 : i32 to f32
      %264 = arith.mulf %263, %cst_5 : f32
      %cst_90 = arith.constant 0.000000e+00 : f32
      %265 = vector.broadcast %cst_90 : f32 to vector<1x128xf32>
      %266 = arith.cmpf olt, %228, %265 : vector<1x128xf32>
      %267 = arith.andi %266, %261 : vector<1x128xi1>
      %268 = vector.broadcast %264 : f32 to vector<1x128xf32>
      %269 = arith.select %267, %268, %228 : vector<1x128xi1>, vector<1x128xf32>
      %c6_i32 = arith.constant 6 : i32
      %270 = arith.addi %23, %c6_i32 : i32
      %cst_91 = arith.constant dense<0.000000e+00> : vector<128xf32>
      %271 = vector.multi_reduction <add>, %257, %cst_91 [0] : vector<10x128xf32> to vector<128xf32>
      %272 = vector.shape_cast %271 : vector<128xf32> to vector<1x128xf32>
      %cst_92 = arith.constant 8.386200e+01 : f32
      %273 = vector.broadcast %cst_92 : f32 to vector<10x128xf32>
      %274 = arith.mulf %273, %257 : vector<10x128xf32>
      %cst_93 = arith.constant 1.341900e+01 : f32
      %275 = vector.broadcast %cst_93 : f32 to vector<1x128xf32>
      %276 = arith.mulf %275, %272 : vector<1x128xf32>
      %277 = vector.broadcast %276 : vector<1x128xf32> to vector<10x128xf32>
      %278 = arith.subf %274, %277 : vector<10x128xf32>
      %279 = arith.addf %278, %5 : vector<10x128xf32>
      %cst_94 = arith.constant -1.540000e-01 : f32
      %280 = vector.broadcast %cst_94 : f32 to vector<10x128xf32>
      %281 = arith.mulf %280, %279 : vector<10x128xf32>
      %282 = math.exp %281 : vector<10x128xf32>
      %cst_95 = arith.constant 1.000000e+00 : f32
      %283 = vector.broadcast %cst_95 : f32 to vector<10x128xf32>
      %284 = arith.subf %283, %282 : vector<10x128xf32>
      %285 = tpu.reciprocal %284 {approx = true} : vector<10x128xf32> -> vector<10x128xf32>
      %286 = arith.mulf %279, %285 : vector<10x128xf32>
      %287 = math.absf %284 : vector<10x128xf32>
      %cst_96 = arith.constant 9.99999997E-7 : f32
      %288 = vector.broadcast %cst_96 : f32 to vector<10x128xf32>
      %289 = arith.cmpf olt, %287, %288 : vector<10x128xf32>
      %cst_97 = arith.constant 6.49350643 : f32
      %290 = vector.broadcast %cst_97 : f32 to vector<10x128xf32>
      %291 = arith.select %289, %290, %286 : vector<10x128xi1>, vector<10x128xf32>
      %cst_98 = arith.constant 6.410000e-03 : f32
      %292 = vector.broadcast %cst_98 : f32 to vector<10x128xf32>
      %293 = arith.mulf %292, %291 : vector<10x128xf32>
      %cst_99 = arith.constant 1.000000e-01 : f32
      %294 = vector.broadcast %cst_99 : f32 to vector<10x128xf32>
      %295 = arith.addf %293, %294 : vector<10x128xf32>
      %296 = arith.mulf %257, %295 : vector<10x128xf32>
      %297 = arith.subf %293, %296 : vector<10x128xf32>
      %298 = arith.addf %257, %297 : vector<10x128xf32>
      %cst_100 = arith.constant dense<0xFF800000> : vector<128xf32>
      %299 = vector.multi_reduction <maximumf>, %291, %cst_100 [0] : vector<10x128xf32> to vector<128xf32>
      %300 = vector.shape_cast %299 : vector<128xf32> to vector<1x128xf32>
      %cst_101 = arith.constant 1.500000e+01 : f32
      %301 = vector.broadcast %cst_101 : f32 to vector<1x128xf32>
      %302 = arith.cmpf oge, %300, %301 : vector<1x128xf32>
      %c1_i32_102 = arith.constant 1 : i32
      %303 = arith.addi %270, %c1_i32_102 : i32
      %304 = arith.sitofp %303 : i32 to f32
      %305 = arith.mulf %304, %cst_5 : f32
      %cst_103 = arith.constant 0.000000e+00 : f32
      %306 = vector.broadcast %cst_103 : f32 to vector<1x128xf32>
      %307 = arith.cmpf olt, %269, %306 : vector<1x128xf32>
      %308 = arith.andi %307, %302 : vector<1x128xi1>
      %309 = vector.broadcast %305 : f32 to vector<1x128xf32>
      %310 = arith.select %308, %309, %269 : vector<1x128xi1>, vector<1x128xf32>
      %c7_i32 = arith.constant 7 : i32
      %311 = arith.addi %23, %c7_i32 : i32
      %cst_104 = arith.constant dense<0.000000e+00> : vector<128xf32>
      %312 = vector.multi_reduction <add>, %298, %cst_104 [0] : vector<10x128xf32> to vector<128xf32>
      %313 = vector.shape_cast %312 : vector<128xf32> to vector<1x128xf32>
      %cst_105 = arith.constant 8.386200e+01 : f32
      %314 = vector.broadcast %cst_105 : f32 to vector<10x128xf32>
      %315 = arith.mulf %314, %298 : vector<10x128xf32>
      %cst_106 = arith.constant 1.341900e+01 : f32
      %316 = vector.broadcast %cst_106 : f32 to vector<1x128xf32>
      %317 = arith.mulf %316, %313 : vector<1x128xf32>
      %318 = vector.broadcast %317 : vector<1x128xf32> to vector<10x128xf32>
      %319 = arith.subf %315, %318 : vector<10x128xf32>
      %320 = arith.addf %319, %5 : vector<10x128xf32>
      %cst_107 = arith.constant -1.540000e-01 : f32
      %321 = vector.broadcast %cst_107 : f32 to vector<10x128xf32>
      %322 = arith.mulf %321, %320 : vector<10x128xf32>
      %323 = math.exp %322 : vector<10x128xf32>
      %cst_108 = arith.constant 1.000000e+00 : f32
      %324 = vector.broadcast %cst_108 : f32 to vector<10x128xf32>
      %325 = arith.subf %324, %323 : vector<10x128xf32>
      %326 = tpu.reciprocal %325 {approx = true} : vector<10x128xf32> -> vector<10x128xf32>
      %327 = arith.mulf %320, %326 : vector<10x128xf32>
      %328 = math.absf %325 : vector<10x128xf32>
      %cst_109 = arith.constant 9.99999997E-7 : f32
      %329 = vector.broadcast %cst_109 : f32 to vector<10x128xf32>
      %330 = arith.cmpf olt, %328, %329 : vector<10x128xf32>
      %cst_110 = arith.constant 6.49350643 : f32
      %331 = vector.broadcast %cst_110 : f32 to vector<10x128xf32>
      %332 = arith.select %330, %331, %327 : vector<10x128xi1>, vector<10x128xf32>
      %cst_111 = arith.constant 6.410000e-03 : f32
      %333 = vector.broadcast %cst_111 : f32 to vector<10x128xf32>
      %334 = arith.mulf %333, %332 : vector<10x128xf32>
      %cst_112 = arith.constant 1.000000e-01 : f32
      %335 = vector.broadcast %cst_112 : f32 to vector<10x128xf32>
      %336 = arith.addf %334, %335 : vector<10x128xf32>
      %337 = arith.mulf %298, %336 : vector<10x128xf32>
      %338 = arith.subf %334, %337 : vector<10x128xf32>
      %339 = arith.addf %298, %338 : vector<10x128xf32>
      %cst_113 = arith.constant dense<0xFF800000> : vector<128xf32>
      %340 = vector.multi_reduction <maximumf>, %332, %cst_113 [0] : vector<10x128xf32> to vector<128xf32>
      %341 = vector.shape_cast %340 : vector<128xf32> to vector<1x128xf32>
      %cst_114 = arith.constant 1.500000e+01 : f32
      %342 = vector.broadcast %cst_114 : f32 to vector<1x128xf32>
      %343 = arith.cmpf oge, %341, %342 : vector<1x128xf32>
      %c1_i32_115 = arith.constant 1 : i32
      %344 = arith.addi %311, %c1_i32_115 : i32
      %345 = arith.sitofp %344 : i32 to f32
      %346 = arith.mulf %345, %cst_5 : f32
      %cst_116 = arith.constant 0.000000e+00 : f32
      %347 = vector.broadcast %cst_116 : f32 to vector<1x128xf32>
      %348 = arith.cmpf olt, %310, %347 : vector<1x128xf32>
      %349 = arith.andi %348, %343 : vector<1x128xi1>
      %350 = vector.broadcast %346 : f32 to vector<1x128xf32>
      %351 = arith.select %349, %350, %310 : vector<1x128xi1>, vector<1x128xf32>
      %c8_i32_117 = arith.constant 8 : i32
      %c1_i32_118 = arith.constant 1 : i32
      %352 = arith.addi %arg3, %c1_i32_118 : i32
      scf.yield %352, %339, %351 : i32, vector<10x128xf32>, vector<1x128xf32>
    }
    %cst_6 = arith.constant 0.000000e+00 : f32
    %17 = vector.broadcast %cst_6 : f32 to vector<1x128xf32>
    %18 = arith.cmpf olt, %16#2, %17 : vector<1x128xf32>
    %cst_7 = arith.constant 2.000000e+02 : f32
    %cst_8 = arith.constant 1.000000e+01 : f32
    %19 = arith.mulf %cst_7, %cst_8 : f32
    %20 = vector.broadcast %19 : f32 to vector<1x128xf32>
    %21 = arith.select %18, %20, %16#2 : vector<1x128xi1>, vector<1x128xf32>
    %c0_9 = arith.constant 0 : index
    %c0_10 = arith.constant 0 : index
    %22 = vector.load %arg2[%c0_9, %c0_10] : memref<1x128xf32, #tpu.memory_space<vmem>>, vector<1x128xf32>
    tpu.vector_store %arg2[%c0_9, %c0_10], %21 {strides = array<i32>} : memref<1x128xf32, #tpu.memory_space<vmem>>, vector<1x128xf32>,
    return
  }
  func.func @transform_0(%arg0: i32) -> (i32, i32) {
    %c0_i32 = arith.constant 0 : i32
    %c0_i32_0 = arith.constant 0 : i32
    return %c0_i32, %arg0 : i32, i32
  }
  func.func @transform_1(%arg0: i32) -> (i32, i32) {
    %c0_i32 = arith.constant 0 : i32
    %c0_i32_0 = arith.constant 0 : i32
    return %c0_i32, %arg0 : i32, i32
  }
}

</mosaic_0001>

<bundles_post_ra>
// kernel: tpu_custom_call.1
= control target key start
LH: loop header
LB: loop body
LE: loop exit
PB: predicated region body
PF: predicated region fallthrough
CT: control target
= control target key end

     0   :  { %6 = vsyncpa [#allocation3], 0  ;;  %s971_s0 = inlined_call_operand.hbm [shape: f32[10,128], index: 0, kind: input, shape index: {}]   ;;  %s972_s1 = inlined_call_operand.hbm [shape: f32[1,128], index: 1, kind: output, shape index: {}]  }
   0x1   :  { %7 = vsyncpa [#allocation4], 0  ;;  %s763_s6 = smov [#allocation2]  }
   0x2   :  { %s13_s7 = sshll.u32 %s763_s6, 4  ;;  %s14_s7 = int_to_ptr.vmem [resolvable:$true] %s13_s7 }
   0x3   :  { %s687_s8 = scalar_lea.vmem %s14_s7, 256  ;;  %p692_p1 = scmp.lt.s32.totalorder %s14_s7, %s14_s7 }
   0x4   :  { %p688_p0 = scmp.ne.s32.totalorder %s14_s7, %s687_s8  ;;  %p693_p2 = scmp.lt.s32.totalorder %s687_s8, %s687_s8 }
   0x6   :  { %p694_p3 = por %p693_p2, %p692_p1 }
   0x8   :  { %p695_p4 = pnand %p694_p3, %p688_p0 }
   0xa   :  { %698 = shalt.err (!%p695_p4)
}
   0xb   :  { %s764_s9 = smov 128   ;;  %s765_s10 = smov 8  }
   0xc   :  { %19 = dma.hbm_to_vmem [thread:$0]  %s971_s0, 256, %s14_s7, [#allocation3], %s764_s9, %s764_s9, %s765_s10  }
   0xd   :  { %739 = dma.done.wait [#allocation3], 256  }
   0xe   :  { %740 = vsyncadd [#allocation3], 4294967040  ;;  %v31_v0 = vlaneseq  ;;  %v766_v2 = vmov 0.0   ;;  %v23_v4 = vld [vmem:[#allocation2] sm:$0xff]  ;;  %v24_v5 = vld [vmem:[#allocation2 + $0x8] sm:$0x3] }
   0xf   :  { %v25_v6 = vand.u32 2147483647, %v23_v4  ;;  %v26_v7 = vand.u32 2147483647, %v24_v5 }
  0x10   :  { %v32_v1 = vand.u32 127, %v31_v0 }
  0x11   :  { %v27_v8 = vmul.f32 0.02808, %v25_v6  ;;  %v28_v9 = vmul.f32 0.02808, %v26_v7 }
  0x12   :  { %vm36_vm0 = vcmp.lt.s32.totalorder %v32_v1, 2 }
  0x13   :  { %v37_v3 = vsel %vm36_vm0, -1.0, %v766_v2   ;;  %v781_v10 = vadd.f32 -20.115, %v27_v8  ;;  %v783_v11 = vadd.f32 -20.115, %v28_v9 }
  0x14   :  { %550 = vmin.xlane.f32.xlu0 %v37_v3  ;;  %v973_v13 = vmov %v37_v3 }
  0x9d   :  { %v551_v12 = vpop.xlane.xlu0 %550 }
  0x9e   :  { %566 = vpush %v551_v12 }
  0xcf   :  { %s567_s0 = spop %566 }
  0xd0   :  { %p553_p5 = scmp.lt.f32.partialorder %s567_s0, 0.0 }
  0xd1   :  { %v789_v14 = vmov (%p553_p5), 0.1   ;;  %v791_v15 = vmov (%p553_p5), 0.1   ;;  %s793_s13 = smov (%p553_p5), 0  }
  0xd2   :  { %555 = sbr.rel (!%p553_p5) target bundleno = 973 (0x3cd), region = 29 }
  0xd7 LB: > { %vm53_vm1 = vcmask 1041408   ;;  %v62_v24 = vmul.f32 83.862, %v753_v15  ;;  %v63_v25 = vmul.f32 83.862, %v749_v14  ;;  %s819_s14 = sshll.u32 %s757_s13, 3  ;;  %s757_s13 = sphi %s793_s13, %s975_s13   ;;  %v753_v15 = vphi %v791_v15, %v508_v15   ;;  %v749_v14 = vphi %v789_v14, %v509_v14   ;;  %v745_v3 = vphi %v37_v3, %v974_v3  }
  0xd8   : > { %v54_v16 = vsel %vm53_vm1, %v749_v14, 0.0  ;;  %s106_s15 = sadd.s32 1, %s819_s14  ;;  %s165_s18 = sadd.s32 2, %s819_s14  ;;  %vm109_vm7 = vcmp.lt.f32.partialorder %v745_v3, 0.0 }
  0xd9   : > { %v55_v17 = vadd.f32 %v753_v15, %v54_v16  ;;  %s107_s16 = scvt.s32.f32 %s106_s15  ;;  %s166_s19 = scvt.s32.f32 %s165_s18 }
  0xda   : > { %s224_s21 = sadd.s32 3, %s819_s14  ;;  %s283_s24 = sadd.s32 4, %s819_s14 }
  0xdb   : > { %v56_v18 = vrot.slane %v55_v17, 4  ;;  %s108_s17 = smul.f32 10.0, %s107_s16  ;;  %s225_s22 = scvt.s32.f32 %s224_s21 }
  0xdc   : > { %s167_s20 = smul.f32 10.0, %s166_s19  ;;  %s284_s25 = scvt.s32.f32 %s283_s24 }
  0xdd   : > { %v57_v19 = vadd.f32 %v56_v18, %v55_v17  ;;  %s226_s23 = smul.f32 10.0, %s225_s22  ;;  %s342_s27 = sadd.s32 5, %s819_s14 }
  0xde   : > { %s285_s26 = smul.f32 10.0, %s284_s25  ;;  %s343_s28 = scvt.s32.f32 %s342_s27 }
  0xdf   : > { %v58_v20 = vrot.slane %v57_v19, 2  ;;  %s401_s30 = sadd.s32 6, %s819_s14  ;;  %s526_s4 = sadd.s32 1, %s757_s13  }
  0xe0   : > { %s344_s29 = smul.f32 10.0, %s343_s28  ;;  %s402_s2 = scvt.s32.f32 %s401_s30 }
  0xe1   : > { %v59_v21 = vadd.f32 %v58_v20, %v57_v19  ;;  %s460_s5 = sadd.s32 7, %s819_s14  ;;  %s519_s8 = sadd.s32 8, %s819_s14 }
  0xe2   : > { %s403_s3 = smul.f32 10.0, %s402_s2  ;;  %s461_s6 = scvt.s32.f32 %s460_s5 }
  0xe3   : > { %v60_v22 = vrot.slane %v59_v21, 1  ;;  %s520_s9 = scvt.s32.f32 %s519_s8  ;;  %p43_p6 = scmp.lt.s32.totalorder %s526_s4, 25 }
  0xe4   : > { %s462_s7 = smul.f32 10.0, %s461_s6  ;;  %s975_s13 = smov %s526_s4 }
  0xe5   : > { %v61_v23 = vadd.f32 %v60_v22, %v59_v21  ;;  %s521_s10 = smul.f32 10.0, %s520_s9 }
  0xe7   : > { %v64_v26 = vmul.f32 13.419, %v61_v23 }
  0xe9   : > { %v65_v27 = vsub.f32 %v62_v24, %v64_v26  ;;  %v66_v28 = vsub.f32 %v63_v25, %v64_v26 }
  0xeb   : > { %v67_v29 = vadd.f32 %v65_v27, %v781_v10  ;;  %v68_v30 = vadd.f32 %v66_v28, %v783_v11 }
  0xed   : > { %v69_v31 = vmul.f32 -0.154, %v67_v29  ;;  %v70_v32 = vmul.f32 -0.154, %v68_v30 }
  0xef   : > { %v71_v33 = vmul.f32 1.442695, %v69_v31  ;;  %v73_v34 = vmul.f32 1.442695, %v70_v32 }
  0xf1   : > { %615 = vpow2.f32 %v71_v33 }
  0xf2   : > { %617 = vpow2.f32 %v73_v34 }
  0xfe   : > { %v616_v35 = vpop.eup %615 }
  0xff   : > { %v618_v36 = vpop.eup %617  ;;  %v75_v37 = vsub.f32 1.0, %v616_v35 }
 0x100   : > { %v76_v38 = vsub.f32 1.0, %v618_v36 }
 0x101   : > { %619 = vrcp.f32 %v75_v37  ;;  %v81_v39 = vand.u32 2147483647, %v75_v37 }
 0x102   : > { %621 = vrcp.f32 %v76_v38  ;;  %v82_v40 = vand.u32 2147483647, %v76_v38 }
 0x103   : > { %vm83_vm2 = vcmp.lt.f32.partialorder %v81_v39, 1e-06 }
 0x104   : > { %vm84_vm3 = vcmp.lt.f32.partialorder %v82_v40, 1e-06 }
 0x10e   : > { %v620_v41 = vpop.eup %619 }
 0x10f   : > { %v622_v42 = vpop.eup %621  ;;  %v79_v43 = vmul.f32 %v620_v41, %v67_v29 }
 0x110   : > { %v80_v44 = vmul.f32 %v622_v42, %v68_v30 }
 0x111   : > { %v85_v45 = vsel %vm83_vm2, 6.4935064, %v79_v43 }
 0x112   : > { %v86_v46 = vsel %vm84_vm3, 6.4935064, %v80_v44  ;;  %v87_v47 = vmul.f32 0.00641, %v85_v45 }
 0x113   : > { %v88_v48 = vmul.f32 0.00641, %v86_v46  ;;  %v97_v49 = vsel %vm53_vm1, %v86_v46, -inf }
 0x114   : > { %v89_v50 = vadd.f32 0.1, %v87_v47  ;;  %v98_v51 = vmax.f32 %v85_v45, %v97_v49 }
 0x115   : > { %v90_v52 = vadd.f32 0.1, %v88_v48 }
 0x116   : > { %v91_v53 = vmul.f32 %v753_v15, %v89_v50  ;;  %v99_v19 = vrot.slane %v98_v51, 4 }
 0x117   : > { %v92_v54 = vmul.f32 %v749_v14, %v90_v52 }
 0x118   : > { %v93_v55 = vsub.f32 %v87_v47, %v91_v53  ;;  %v100_v22 = vmax.f32 %v98_v51, %v99_v19  ;;  %v111_v47 = vstv %s108_s17 }
 0x119   : > { %v94_v56 = vsub.f32 %v88_v48, %v92_v54 }
 0x11a   : > { %v807_v57 = vadd.f32 %v753_v15, %v93_v55  ;;  %v101_v23 = vrot.slane %v100_v22, 2 }
 0x11b   : > { %v809_v58 = vadd.f32 %v749_v14, %v94_v56 }
 0x11c   : > { %v121_v4 = vmul.f32 83.862, %v807_v57  ;;  %v102_v25 = vmax.f32 %v100_v22, %v101_v23 }
 0x11d   : > { %v113_v59 = vsel %vm53_vm1, %v809_v58, 0.0  ;;  %v122_v5 = vmul.f32 83.862, %v809_v58 }
 0x11e   : > { %v114_v60 = vadd.f32 %v113_v59, %v807_v57  ;;  %v103_v29 = vrot.slane %v102_v25, 1 }
 0x120   : > { %v115_v61 = vrot.slane %v114_v60, 4  ;;  %v104_v35 = vmax.f32 %v102_v25, %v103_v29 }
 0x122   : > { %v116_v62 = vadd.f32 %v115_v61, %v114_v60  ;;  %vm105_vm6 = vcmp.ge.f32.partialorder %v104_v35, 15.0  ;;  %v170_v60 = vstv %s167_s20 }
 0x123   : > { %vm110_vm8 = vmand %vm109_vm7, %vm105_vm6 }
 0x124   : > { %v117_v63 = vrot.slane %v116_v62, 2  ;;  %v112_v52 = vsel %vm110_vm8, %v111_v47, %v745_v3  ;;  %v229_v47 = vstv %s226_s23 }
 0x125   : > { %vm168_vm9 = vcmp.lt.f32.partialorder %v112_v52, 0.0 }
 0x126   : > { %v118_v0 = vadd.f32 %v117_v63, %v116_v62 }
 0x128   : > { %v119_v1 = vrot.slane %v118_v0, 1 }
 0x12a   : > { %v120_v2 = vadd.f32 %v119_v1, %v118_v0 }
 0x12c   : > { %v123_v6 = vmul.f32 13.419, %v120_v2 }
 0x12e   : > { %v124_v7 = vsub.f32 %v121_v4, %v123_v6  ;;  %v125_v8 = vsub.f32 %v122_v5, %v123_v6 }
 0x130   : > { %v126_v9 = vadd.f32 %v124_v7, %v781_v10  ;;  %v127_v12 = vadd.f32 %v125_v8, %v783_v11 }
 0x132   : > { %v128_v13 = vmul.f32 -0.154, %v126_v9  ;;  %v129_v14 = vmul.f32 -0.154, %v127_v12 }
 0x134   : > { %v130_v15 = vmul.f32 1.442695, %v128_v13  ;;  %v132_v16 = vmul.f32 1.442695, %v129_v14 }
 0x136   : > { %623 = vpow2.f32 %v130_v15 }
 0x137   : > { %625 = vpow2.f32 %v132_v16 }
 0x143   : > { %v624_v17 = vpop.eup %623 }
 0x144   : > { %v626_v18 = vpop.eup %625  ;;  %v134_v20 = vsub.f32 1.0, %v624_v17 }
 0x145   : > { %v135_v21 = vsub.f32 1.0, %v626_v18 }
 0x146   : > { %627 = vrcp.f32 %v134_v20  ;;  %v140_v24 = vand.u32 2147483647, %v134_v20 }
 0x147   : > { %629 = vrcp.f32 %v135_v21  ;;  %v141_v26 = vand.u32 2147483647, %v135_v21 }
 0x148   : > { %vm142_vm4 = vcmp.lt.f32.partialorder %v140_v24, 1e-06 }
 0x149   : > { %vm143_vm5 = vcmp.lt.f32.partialorder %v141_v26, 1e-06 }
 0x153   : > { %v628_v27 = vpop.eup %627 }
 0x154   : > { %v630_v28 = vpop.eup %629  ;;  %v138_v30 = vmul.f32 %v628_v27, %v126_v9 }
 0x155   : > { %v139_v31 = vmul.f32 %v630_v28, %v127_v12 }
 0x156   : > { %v144_v32 = vsel %vm142_vm4, 6.4935064, %v138_v30 }
 0x157   : > { %v145_v33 = vsel %vm143_vm5, 6.4935064, %v139_v31  ;;  %v146_v34 = vmul.f32 0.00641, %v144_v32 }
 0x158   : > { %v147_v36 = vmul.f32 0.00641, %v145_v33  ;;  %v156_v37 = vsel %vm53_vm1, %v145_v33, -inf }
 0x159   : > { %v148_v38 = vadd.f32 0.1, %v146_v34  ;;  %v157_v39 = vmax.f32 %v144_v32, %v156_v37 }
 0x15a   : > { %v149_v40 = vadd.f32 0.1, %v147_v36 }
 0x15b   : > { %v150_v41 = vmul.f32 %v148_v38, %v807_v57  ;;  %v158_v42 = vrot.slane %v157_v39, 4 }
 0x15c   : > { %v151_v43 = vmul.f32 %v149_v40, %v809_v58 }
 0x15d   : > { %v152_v44 = vsub.f32 %v146_v34, %v150_v41  ;;  %v159_v45 = vmax.f32 %v157_v39, %v158_v42 }
 0x15e   : > { %v153_v46 = vsub.f32 %v147_v36, %v151_v43 }
 0x15f   : > { %v828_v48 = vadd.f32 %v152_v44, %v807_v57  ;;  %v160_v49 = vrot.slane %v159_v45, 2 }
 0x160   : > { %v831_v50 = vadd.f32 %v153_v46, %v809_v58 }
 0x161   : > { %v161_v51 = vmax.f32 %v159_v45, %v160_v49  ;;  %v180_v0 = vmul.f32 83.862, %v828_v48 }
 0x162   : > { %v172_v53 = vsel %vm53_vm1, %v831_v50, 0.0  ;;  %v181_v1 = vmul.f32 83.862, %v831_v50 }
 0x163   : > { %v162_v54 = vrot.slane %v161_v51, 1  ;;  %v173_v55 = vadd.f32 %v172_v53, %v828_v48 }
 0x165   : > { %v163_v56 = vmax.f32 %v161_v51, %v162_v54  ;;  %v174_v59 = vrot.slane %v173_v55, 4 }
 0x167   : > { %vm164_vm10 = vcmp.ge.f32.partialorder %v163_v56, 15.0  ;;  %v175_v57 = vadd.f32 %v174_v59, %v173_v55 }
 0x168   : > { %vm169_vm11 = vmand %vm168_vm9, %vm164_vm10 }
 0x169   : > { %v837_v61 = vsel %vm169_vm11, %v170_v60, %v112_v52  ;;  %v176_v58 = vrot.slane %v175_v57, 2 }
 0x16a   : > { %vm227_vm14 = vcmp.lt.f32.partialorder %v837_v61, 0.0 }
 0x16b   : > { %v177_v62 = vadd.f32 %v176_v58, %v175_v57 }
 0x16d   : > { %v178_v63 = vrot.slane %v177_v62, 1 }
 0x16f   : > { %v179_v3 = vadd.f32 %v178_v63, %v177_v62 }
 0x171   : > { %v182_v2 = vmul.f32 13.419, %v179_v3 }
 0x173   : > { %v183_v4 = vsub.f32 %v180_v0, %v182_v2  ;;  %v184_v5 = vsub.f32 %v181_v1, %v182_v2 }
 0x175   : > { %v185_v6 = vadd.f32 %v183_v4, %v781_v10  ;;  %v186_v7 = vadd.f32 %v184_v5, %v783_v11 }
 0x177   : > { %v187_v8 = vmul.f32 -0.154, %v185_v6  ;;  %v188_v9 = vmul.f32 -0.154, %v186_v7 }
 0x179   : > { %v189_v12 = vmul.f32 1.442695, %v187_v8  ;;  %v191_v13 = vmul.f32 1.442695, %v188_v9 }
 0x17b   : > { %631 = vpow2.f32 %v189_v12 }
 0x17c   : > { %633 = vpow2.f32 %v191_v13 }
 0x188   : > { %v632_v14 = vpop.eup %631 }
 0x189   : > { %v634_v15 = vpop.eup %633  ;;  %v193_v16 = vsub.f32 1.0, %v632_v14 }
 0x18a   : > { %v194_v17 = vsub.f32 1.0, %v634_v15 }
 0x18b   : > { %635 = vrcp.f32 %v193_v16  ;;  %v199_v18 = vand.u32 2147483647, %v193_v16 }
 0x18c   : > { %637 = vrcp.f32 %v194_v17  ;;  %v200_v19 = vand.u32 2147483647, %v194_v17 }
 0x18d   : > { %vm201_vm12 = vcmp.lt.f32.partialorder %v199_v18, 1e-06 }
 0x18e   : > { %vm202_vm13 = vcmp.lt.f32.partialorder %v200_v19, 1e-06 }
 0x198   : > { %v636_v20 = vpop.eup %635 }
 0x199   : > { %v638_v21 = vpop.eup %637  ;;  %v197_v22 = vmul.f32 %v636_v20, %v185_v6 }
 0x19a   : > { %v198_v23 = vmul.f32 %v638_v21, %v186_v7 }
 0x19b   : > { %v203_v24 = vsel %vm201_vm12, 6.4935064, %v197_v22 }
 0x19c   : > { %v204_v25 = vsel %vm202_vm13, 6.4935064, %v198_v23  ;;  %v205_v26 = vmul.f32 0.00641, %v203_v24 }
 0x19d   : > { %v206_v27 = vmul.f32 0.00641, %v204_v25  ;;  %v215_v28 = vsel %vm53_vm1, %v204_v25, -inf }
 0x19e   : > { %v207_v29 = vadd.f32 0.1, %v205_v26  ;;  %v216_v30 = vmax.f32 %v203_v24, %v215_v28 }
 0x19f   : > { %v208_v31 = vadd.f32 0.1, %v206_v27 }
 0x1a0   : > { %v209_v32 = vmul.f32 %v207_v29, %v828_v48  ;;  %v217_v33 = vrot.slane %v216_v30, 4 }
 0x1a1   : > { %v210_v34 = vmul.f32 %v208_v31, %v831_v50 }
 0x1a2   : > { %v211_v35 = vsub.f32 %v205_v26, %v209_v32  ;;  %v218_v36 = vmax.f32 %v216_v30, %v217_v33 }
 0x1a3   : > { %v212_v37 = vsub.f32 %v206_v27, %v210_v34 }
 0x1a4   : > { %v848_v38 = vadd.f32 %v211_v35, %v828_v48  ;;  %v219_v39 = vrot.slane %v218_v36, 2 }
 0x1a5   : > { %v851_v40 = vadd.f32 %v212_v37, %v831_v50 }
 0x1a6   : > { %v220_v41 = vmax.f32 %v218_v36, %v219_v39  ;;  %v239_v54 = vmul.f32 83.862, %v848_v38  ;;  %v288_v36 = vstv %s285_s26 }
 0x1a7   : > { %v231_v42 = vsel %vm53_vm1, %v851_v40, 0.0  ;;  %v240_v55 = vmul.f32 83.862, %v851_v40 }
 0x1a8   : > { %v221_v43 = vrot.slane %v220_v41, 1  ;;  %v232_v44 = vadd.f32 %v231_v42, %v848_v38 }
 0x1aa   : > { %v222_v45 = vmax.f32 %v220_v41, %v221_v43  ;;  %v233_v46 = vrot.slane %v232_v44, 4 }
 0x1ac   : > { %vm223_vm15 = vcmp.ge.f32.partialorder %v222_v45, 15.0  ;;  %v234_v48 = vadd.f32 %v233_v46, %v232_v44 }
 0x1ad   : > { %vm228_vm0 = vmand %vm227_vm14, %vm223_vm15 }
 0x1ae   : > { %v858_v49 = vsel %vm228_vm0, %v229_v47, %v837_v61  ;;  %v235_v50 = vrot.slane %v234_v48, 2 }
 0x1af   : > { %vm286_vm4 = vcmp.lt.f32.partialorder %v858_v49, 0.0 }
 0x1b0   : > { %v236_v51 = vadd.f32 %v235_v50, %v234_v48 }
 0x1b2   : > { %v237_v52 = vrot.slane %v236_v51, 1 }
 0x1b4   : > { %v238_v53 = vadd.f32 %v237_v52, %v236_v51 }
 0x1b6   : > { %v241_v56 = vmul.f32 13.419, %v238_v53 }
 0x1b8   : > { %v242_v59 = vsub.f32 %v239_v54, %v241_v56  ;;  %v243_v60 = vsub.f32 %v240_v55, %v241_v56 }
 0x1ba   : > { %v244_v57 = vadd.f32 %v242_v59, %v781_v10  ;;  %v245_v58 = vadd.f32 %v243_v60, %v783_v11 }
 0x1bc   : > { %v246_v62 = vmul.f32 -0.154, %v244_v57  ;;  %v247_v63 = vmul.f32 -0.154, %v245_v58 }
 0x1be   : > { %v248_v3 = vmul.f32 1.442695, %v246_v62  ;;  %v250_v61 = vmul.f32 1.442695, %v247_v63 }
 0x1c0   : > { %639 = vpow2.f32 %v248_v3 }
 0x1c1   : > { %641 = vpow2.f32 %v250_v61 }
 0x1cd   : > { %v640_v0 = vpop.eup %639 }
 0x1ce   : > { %v642_v1 = vpop.eup %641  ;;  %v252_v2 = vsub.f32 1.0, %v640_v0 }
 0x1cf   : > { %v253_v4 = vsub.f32 1.0, %v642_v1 }
 0x1d0   : > { %643 = vrcp.f32 %v252_v2  ;;  %v258_v5 = vand.u32 2147483647, %v252_v2 }
 0x1d1   : > { %645 = vrcp.f32 %v253_v4  ;;  %v259_v6 = vand.u32 2147483647, %v253_v4 }
 0x1d2   : > { %vm260_vm2 = vcmp.lt.f32.partialorder %v258_v5, 1e-06 }
 0x1d3   : > { %vm261_vm3 = vcmp.lt.f32.partialorder %v259_v6, 1e-06 }
 0x1dd   : > { %v644_v7 = vpop.eup %643 }
 0x1de   : > { %v646_v8 = vpop.eup %645  ;;  %v256_v9 = vmul.f32 %v644_v7, %v244_v57 }
 0x1df   : > { %v257_v12 = vmul.f32 %v646_v8, %v245_v58 }
 0x1e0   : > { %v262_v13 = vsel %vm260_vm2, 6.4935064, %v256_v9 }
 0x1e1   : > { %v263_v14 = vsel %vm261_vm3, 6.4935064, %v257_v12  ;;  %v264_v15 = vmul.f32 0.00641, %v262_v13 }
 0x1e2   : > { %v265_v16 = vmul.f32 0.00641, %v263_v14  ;;  %v274_v17 = vsel %vm53_vm1, %v263_v14, -inf }
 0x1e3   : > { %v266_v18 = vadd.f32 0.1, %v264_v15  ;;  %v275_v19 = vmax.f32 %v262_v13, %v274_v17 }
 0x1e4   : > { %v267_v20 = vadd.f32 0.1, %v265_v16 }
 0x1e5   : > { %v268_v21 = vmul.f32 %v266_v18, %v848_v38  ;;  %v276_v22 = vrot.slane %v275_v19, 4 }
 0x1e6   : > { %v269_v23 = vmul.f32 %v267_v20, %v851_v40 }
 0x1e7   : > { %v270_v24 = vsub.f32 %v264_v15, %v268_v21  ;;  %v277_v25 = vmax.f32 %v275_v19, %v276_v22 }
 0x1e8   : > { %v271_v26 = vsub.f32 %v265_v16, %v269_v23 }
 0x1e9   : > { %v869_v27 = vadd.f32 %v270_v24, %v848_v38  ;;  %v278_v28 = vrot.slane %v277_v25, 2 }
 0x1ea   : > { %v872_v29 = vadd.f32 %v271_v26, %v851_v40 }
 0x1eb   : > { %v279_v30 = vmax.f32 %v277_v25, %v278_v28  ;;  %v298_v43 = vmul.f32 83.862, %v869_v27  ;;  %v347_v25 = vstv %s344_s29 }
 0x1ec   : > { %v290_v31 = vsel %vm53_vm1, %v872_v29, 0.0  ;;  %v299_v44 = vmul.f32 83.862, %v872_v29 }
 0x1ed   : > { %v280_v32 = vrot.slane %v279_v30, 1  ;;  %v291_v33 = vadd.f32 %v290_v31, %v869_v27 }
 0x1ef   : > { %v281_v34 = vmax.f32 %v279_v30, %v280_v32  ;;  %v292_v35 = vrot.slane %v291_v33, 4 }
 0x1f1   : > { %vm282_vm5 = vcmp.ge.f32.partialorder %v281_v34, 15.0  ;;  %v293_v37 = vadd.f32 %v292_v35, %v291_v33 }
 0x1f2   : > { %vm287_vm6 = vmand %vm286_vm4, %vm282_vm5 }
 0x1f3   : > { %v879_v38 = vsel %vm287_vm6, %v288_v36, %v858_v49  ;;  %v294_v39 = vrot.slane %v293_v37, 2 }
 0x1f4   : > { %vm345_vm9 = vcmp.lt.f32.partialorder %v879_v38, 0.0 }
 0x1f5   : > { %v295_v40 = vadd.f32 %v294_v39, %v293_v37 }
 0x1f7   : > { %v296_v41 = vrot.slane %v295_v40, 1 }
 0x1f9   : > { %v297_v42 = vadd.f32 %v296_v41, %v295_v40 }
 0x1fb   : > { %v300_v45 = vmul.f32 13.419, %v297_v42 }
 0x1fd   : > { %v301_v46 = vsub.f32 %v298_v43, %v300_v45  ;;  %v302_v47 = vsub.f32 %v299_v44, %v300_v45 }
 0x1ff   : > { %v303_v48 = vadd.f32 %v301_v46, %v781_v10  ;;  %v304_v50 = vadd.f32 %v302_v47, %v783_v11 }
 0x201   : > { %v305_v51 = vmul.f32 -0.154, %v303_v48  ;;  %v306_v52 = vmul.f32 -0.154, %v304_v50 }
 0x203   : > { %v307_v53 = vmul.f32 1.442695, %v305_v51  ;;  %v309_v49 = vmul.f32 1.442695, %v306_v52 }
 0x205   : > { %647 = vpow2.f32 %v307_v53 }
 0x206   : > { %649 = vpow2.f32 %v309_v49 }
 0x212   : > { %v648_v54 = vpop.eup %647 }
 0x213   : > { %v650_v55 = vpop.eup %649  ;;  %v311_v56 = vsub.f32 1.0, %v648_v54 }
 0x214   : > { %v312_v59 = vsub.f32 1.0, %v650_v55 }
 0x215   : > { %651 = vrcp.f32 %v311_v56  ;;  %v317_v60 = vand.u32 2147483647, %v311_v56 }
 0x216   : > { %653 = vrcp.f32 %v312_v59  ;;  %v318_v57 = vand.u32 2147483647, %v312_v59 }
 0x217   : > { %vm319_vm7 = vcmp.lt.f32.partialorder %v317_v60, 1e-06 }
 0x218   : > { %vm320_vm8 = vcmp.lt.f32.partialorder %v318_v57, 1e-06 }
 0x222   : > { %v652_v58 = vpop.eup %651 }
 0x223   : > { %v654_v62 = vpop.eup %653  ;;  %v315_v63 = vmul.f32 %v652_v58, %v303_v48 }
 0x224   : > { %v316_v3 = vmul.f32 %v654_v62, %v304_v50 }
 0x225   : > { %v321_v61 = vsel %vm319_vm7, 6.4935064, %v315_v63 }
 0x226   : > { %v322_v0 = vsel %vm320_vm8, 6.4935064, %v316_v3  ;;  %v323_v1 = vmul.f32 0.00641, %v321_v61 }
 0x227   : > { %v324_v2 = vmul.f32 0.00641, %v322_v0  ;;  %v333_v4 = vsel %vm53_vm1, %v322_v0, -inf }
 0x228   : > { %v325_v5 = vadd.f32 0.1, %v323_v1  ;;  %v334_v6 = vmax.f32 %v321_v61, %v333_v4 }
 0x229   : > { %v326_v7 = vadd.f32 0.1, %v324_v2 }
 0x22a   : > { %v327_v8 = vmul.f32 %v325_v5, %v869_v27  ;;  %v335_v9 = vrot.slane %v334_v6, 4 }
 0x22b   : > { %v328_v12 = vmul.f32 %v326_v7, %v872_v29 }
 0x22c   : > { %v329_v13 = vsub.f32 %v323_v1, %v327_v8  ;;  %v336_v14 = vmax.f32 %v334_v6, %v335_v9 }
 0x22d   : > { %v330_v15 = vsub.f32 %v324_v2, %v328_v12 }
 0x22e   : > { %v890_v16 = vadd.f32 %v329_v13, %v869_v27  ;;  %v337_v17 = vrot.slane %v336_v14, 2 }
 0x22f   : > { %v893_v18 = vadd.f32 %v330_v15, %v872_v29 }
 0x230   : > { %v338_v19 = vmax.f32 %v336_v14, %v337_v17  ;;  %v357_v32 = vmul.f32 83.862, %v890_v16  ;;  %v406_v14 = vstv %s403_s3 }
 0x231   : > { %v349_v20 = vsel %vm53_vm1, %v893_v18, 0.0  ;;  %v358_v33 = vmul.f32 83.862, %v893_v18 }
 0x232   : > { %v339_v21 = vrot.slane %v338_v19, 1  ;;  %v350_v22 = vadd.f32 %v349_v20, %v890_v16 }
 0x234   : > { %v340_v23 = vmax.f32 %v338_v19, %v339_v21  ;;  %v351_v24 = vrot.slane %v350_v22, 4 }
 0x236   : > { %vm341_vm10 = vcmp.ge.f32.partialorder %v340_v23, 15.0  ;;  %v352_v26 = vadd.f32 %v351_v24, %v350_v22 }
 0x237   : > { %vm346_vm11 = vmand %vm345_vm9, %vm341_vm10 }
 0x238   : > { %v900_v27 = vsel %vm346_vm11, %v347_v25, %v879_v38  ;;  %v353_v28 = vrot.slane %v352_v26, 2 }
 0x239   : > { %vm404_vm14 = vcmp.lt.f32.partialorder %v900_v27, 0.0 }
 0x23a   : > { %v354_v29 = vadd.f32 %v353_v28, %v352_v26 }
 0x23c   : > { %v355_v30 = vrot.slane %v354_v29, 1 }
 0x23e   : > { %v356_v31 = vadd.f32 %v355_v30, %v354_v29 }
 0x240   : > { %v359_v34 = vmul.f32 13.419, %v356_v31 }
 0x242   : > { %v360_v35 = vsub.f32 %v357_v32, %v359_v34  ;;  %v361_v36 = vsub.f32 %v358_v33, %v359_v34 }
 0x244   : > { %v362_v37 = vadd.f32 %v360_v35, %v781_v10  ;;  %v363_v39 = vadd.f32 %v361_v36, %v783_v11 }
 0x246   : > { %v364_v40 = vmul.f32 -0.154, %v362_v37  ;;  %v365_v41 = vmul.f32 -0.154, %v363_v39 }
 0x248   : > { %v366_v42 = vmul.f32 1.442695, %v364_v40  ;;  %v368_v38 = vmul.f32 1.442695, %v365_v41 }
 0x24a   : > { %655 = vpow2.f32 %v366_v42 }
 0x24b   : > { %657 = vpow2.f32 %v368_v38 }
 0x257   : > { %v656_v43 = vpop.eup %655 }
 0x258   : > { %v658_v44 = vpop.eup %657  ;;  %v370_v45 = vsub.f32 1.0, %v656_v43 }
 0x259   : > { %v371_v46 = vsub.f32 1.0, %v658_v44 }
 0x25a   : > { %659 = vrcp.f32 %v370_v45  ;;  %v376_v47 = vand.u32 2147483647, %v370_v45 }
 0x25b   : > { %661 = vrcp.f32 %v371_v46  ;;  %v377_v48 = vand.u32 2147483647, %v371_v46 }
 0x25c   : > { %vm378_vm12 = vcmp.lt.f32.partialorder %v376_v47, 1e-06 }
 0x25d   : > { %vm379_vm13 = vcmp.lt.f32.partialorder %v377_v48, 1e-06 }
 0x267   : > { %v660_v50 = vpop.eup %659 }
 0x268   : > { %v662_v51 = vpop.eup %661  ;;  %v374_v52 = vmul.f32 %v660_v50, %v362_v37 }
 0x269   : > { %v375_v53 = vmul.f32 %v662_v51, %v363_v39 }
 0x26a   : > { %v380_v49 = vsel %vm378_vm12, 6.4935064, %v374_v52 }
 0x26b   : > { %v381_v54 = vsel %vm379_vm13, 6.4935064, %v375_v53  ;;  %v382_v55 = vmul.f32 0.00641, %v380_v49 }
 0x26c   : > { %v383_v56 = vmul.f32 0.00641, %v381_v54  ;;  %v392_v59 = vsel %vm53_vm1, %v381_v54, -inf }
 0x26d   : > { %v384_v60 = vadd.f32 0.1, %v382_v55  ;;  %v393_v57 = vmax.f32 %v380_v49, %v392_v59 }
 0x26e   : > { %v385_v58 = vadd.f32 0.1, %v383_v56 }
 0x26f   : > { %v386_v62 = vmul.f32 %v384_v60, %v890_v16  ;;  %v394_v63 = vrot.slane %v393_v57, 4 }
 0x270   : > { %v387_v3 = vmul.f32 %v385_v58, %v893_v18 }
 0x271   : > { %v388_v61 = vsub.f32 %v382_v55, %v386_v62  ;;  %v395_v0 = vmax.f32 %v393_v57, %v394_v63 }
 0x272   : > { %v389_v1 = vsub.f32 %v383_v56, %v387_v3 }
 0x273   : > { %v911_v2 = vadd.f32 %v388_v61, %v890_v16  ;;  %v396_v4 = vrot.slane %v395_v0, 2 }
 0x274   : > { %v914_v5 = vadd.f32 %v389_v1, %v893_v18 }
 0x275   : > { %v397_v6 = vmax.f32 %v395_v0, %v396_v4  ;;  %v416_v21 = vmul.f32 83.862, %v911_v2  ;;  %v465_v0 = vstv %s462_s7 }
 0x276   : > { %v408_v7 = vsel %vm53_vm1, %v914_v5, 0.0  ;;  %v417_v22 = vmul.f32 83.862, %v914_v5 }
 0x277   : > { %v398_v8 = vrot.slane %v397_v6, 1  ;;  %v409_v9 = vadd.f32 %v408_v7, %v911_v2 }
 0x279   : > { %v399_v12 = vmax.f32 %v397_v6, %v398_v8  ;;  %v410_v13 = vrot.slane %v409_v9, 4 }
 0x27b   : > { %vm400_vm15 = vcmp.ge.f32.partialorder %v399_v12, 15.0  ;;  %v411_v15 = vadd.f32 %v410_v13, %v409_v9 }
 0x27c   : > { %vm405_vm0 = vmand %vm404_vm14, %vm400_vm15 }
 0x27d   : > { %v921_v16 = vsel %vm405_vm0, %v406_v14, %v900_v27  ;;  %v412_v17 = vrot.slane %v411_v15, 2 }
 0x27e   : > { %vm463_vm4 = vcmp.lt.f32.partialorder %v921_v16, 0.0 }
 0x27f   : > { %v413_v18 = vadd.f32 %v412_v17, %v411_v15 }
 0x281   : > { %v414_v19 = vrot.slane %v413_v18, 1 }
 0x283   : > { %v415_v20 = vadd.f32 %v414_v19, %v413_v18 }
 0x285   : > { %v418_v23 = vmul.f32 13.419, %v415_v20 }
 0x287   : > { %v419_v24 = vsub.f32 %v416_v21, %v418_v23  ;;  %v420_v25 = vsub.f32 %v417_v22, %v418_v23 }
 0x289   : > { %v421_v26 = vadd.f32 %v419_v24, %v781_v10  ;;  %v422_v28 = vadd.f32 %v420_v25, %v783_v11 }
 0x28b   : > { %v423_v29 = vmul.f32 -0.154, %v421_v26  ;;  %v424_v30 = vmul.f32 -0.154, %v422_v28 }
 0x28d   : > { %v425_v27 = vmul.f32 1.442695, %v423_v29  ;;  %v427_v31 = vmul.f32 1.442695, %v424_v30 }
 0x28f   : > { %663 = vpow2.f32 %v425_v27 }
 0x290   : > { %665 = vpow2.f32 %v427_v31 }
 0x29c   : > { %v664_v32 = vpop.eup %663 }
 0x29d   : > { %v666_v33 = vpop.eup %665  ;;  %v429_v34 = vsub.f32 1.0, %v664_v32 }
 0x29e   : > { %v430_v35 = vsub.f32 1.0, %v666_v33 }
 0x29f   : > { %667 = vrcp.f32 %v429_v34  ;;  %v435_v36 = vand.u32 2147483647, %v429_v34 }
 0x2a0   : > { %669 = vrcp.f32 %v430_v35  ;;  %v436_v37 = vand.u32 2147483647, %v430_v35 }
 0x2a1   : > { %vm437_vm2 = vcmp.lt.f32.partialorder %v435_v36, 1e-06 }
 0x2a2   : > { %vm438_vm3 = vcmp.lt.f32.partialorder %v436_v37, 1e-06 }
 0x2ac   : > { %v668_v39 = vpop.eup %667 }
 0x2ad   : > { %v670_v40 = vpop.eup %669  ;;  %v433_v41 = vmul.f32 %v668_v39, %v421_v26 }
 0x2ae   : > { %v434_v42 = vmul.f32 %v670_v40, %v422_v28 }
 0x2af   : > { %v439_v38 = vsel %vm437_vm2, 6.4935064, %v433_v41 }
 0x2b0   : > { %v440_v43 = vsel %vm438_vm3, 6.4935064, %v434_v42  ;;  %v441_v44 = vmul.f32 0.00641, %v439_v38 }
 0x2b1   : > { %v442_v45 = vmul.f32 0.00641, %v440_v43  ;;  %v451_v46 = vsel %vm53_vm1, %v440_v43, -inf }
 0x2b2   : > { %v443_v47 = vadd.f32 0.1, %v441_v44  ;;  %v452_v48 = vmax.f32 %v439_v38, %v451_v46 }
 0x2b3   : > { %v444_v50 = vadd.f32 0.1, %v442_v45 }
 0x2b4   : > { %v445_v51 = vmul.f32 %v443_v47, %v911_v2  ;;  %v453_v52 = vrot.slane %v452_v48, 4 }
 0x2b5   : > { %v446_v53 = vmul.f32 %v444_v50, %v914_v5  ;;  %v524_v50 = vstv %s521_s10 }
 0x2b6   : > { %v447_v49 = vsub.f32 %v441_v44, %v445_v51  ;;  %v454_v54 = vmax.f32 %v452_v48, %v453_v52 }
 0x2b7   : > { %v448_v55 = vsub.f32 %v442_v45, %v446_v53 }
 0x2b8   : > { %v933_v56 = vadd.f32 %v447_v49, %v911_v2  ;;  %v455_v59 = vrot.slane %v454_v54, 2 }
 0x2b9   : > { %v936_v60 = vadd.f32 %v448_v55, %v914_v5 }
 0x2ba   : > { %v456_v57 = vmax.f32 %v454_v54, %v455_v59  ;;  %v475_v8 = vmul.f32 83.862, %v933_v56 }
 0x2bb   : > { %v467_v58 = vsel %vm53_vm1, %v936_v60, 0.0  ;;  %v476_v9 = vmul.f32 83.862, %v936_v60 }
 0x2bc   : > { %v457_v62 = vrot.slane %v456_v57, 1  ;;  %v468_v63 = vadd.f32 %v467_v58, %v933_v56 }
 0x2be   : > { %v458_v3 = vmax.f32 %v456_v57, %v457_v62  ;;  %v469_v61 = vrot.slane %v468_v63, 4 }
 0x2c0   : > { %vm459_vm5 = vcmp.ge.f32.partialorder %v458_v3, 15.0  ;;  %v470_v1 = vadd.f32 %v469_v61, %v468_v63 }
 0x2c1   : > { %vm464_vm6 = vmand %vm463_vm4, %vm459_vm5 }
 0x2c2   : > { %v466_v2 = vsel %vm464_vm6, %v465_v0, %v921_v16  ;;  %v471_v4 = vrot.slane %v470_v1, 2 }
 0x2c4   : > { %v472_v5 = vadd.f32 %v471_v4, %v470_v1 }
 0x2c6   : > { %v473_v6 = vrot.slane %v472_v5, 1 }
 0x2c8   : > { %v474_v7 = vadd.f32 %v473_v6, %v472_v5 }
 0x2ca   : > { %v477_v12 = vmul.f32 13.419, %v474_v7 }
 0x2cc   : > { %v478_v13 = vsub.f32 %v475_v8, %v477_v12  ;;  %v479_v14 = vsub.f32 %v476_v9, %v477_v12 }
 0x2ce   : > { %v480_v15 = vadd.f32 %v478_v13, %v781_v10  ;;  %v481_v17 = vadd.f32 %v479_v14, %v783_v11 }
 0x2d0   : > { %v482_v18 = vmul.f32 -0.154, %v480_v15  ;;  %v483_v19 = vmul.f32 -0.154, %v481_v17 }
 0x2d2   : > { %v484_v20 = vmul.f32 1.442695, %v482_v18  ;;  %v486_v21 = vmul.f32 1.442695, %v483_v19 }
 0x2d4   : > { %671 = vpow2.f32 %v484_v20 }
 0x2d5   : > { %673 = vpow2.f32 %v486_v21 }
 0x2e1   : > { %v672_v16 = vpop.eup %671 }
 0x2e2   : > { %v674_v22 = vpop.eup %673  ;;  %v488_v23 = vsub.f32 1.0, %v672_v16 }
 0x2e3   : > { %v489_v24 = vsub.f32 1.0, %v674_v22 }
 0x2e4   : > { %675 = vrcp.f32 %v488_v23  ;;  %v494_v25 = vand.u32 2147483647, %v488_v23 }
 0x2e5   : > { %677 = vrcp.f32 %v489_v24  ;;  %v495_v26 = vand.u32 2147483647, %v489_v24 }
 0x2e6   : > { %vm496_vm7 = vcmp.lt.f32.partialorder %v494_v25, 1e-06 }
 0x2e7   : > { %vm497_vm8 = vcmp.lt.f32.partialorder %v495_v26, 1e-06 }
 0x2f1   : > { %v676_v28 = vpop.eup %675 }
 0x2f2   : > { %v678_v29 = vpop.eup %677  ;;  %v492_v30 = vmul.f32 %v676_v28, %v480_v15 }
 0x2f3   : > { %v493_v27 = vmul.f32 %v678_v29, %v481_v17 }
 0x2f4   : > { %v498_v31 = vsel %vm496_vm7, 6.4935064, %v492_v30 }
 0x2f5   : > { %v499_v32 = vsel %vm497_vm8, 6.4935064, %v493_v27  ;;  %v500_v33 = vmul.f32 0.00641, %v498_v31 }
 0x2f6   : > { %v501_v34 = vmul.f32 0.00641, %v499_v32  ;;  %v510_v35 = vsel %vm53_vm1, %v499_v32, -inf  ;;  %vm522_vm1 = vcmp.lt.f32.partialorder %v466_v2, 0.0 }
 0x2f7   : > { %v502_v36 = vadd.f32 0.1, %v500_v33  ;;  %v511_v37 = vmax.f32 %v498_v31, %v510_v35 }
 0x2f8   : > { %v503_v39 = vadd.f32 0.1, %v501_v34 }
 0x2f9   : > { %v504_v40 = vmul.f32 %v502_v36, %v933_v56  ;;  %v512_v41 = vrot.slane %v511_v37, 4 }
 0x2fa   : > { %v505_v42 = vmul.f32 %v503_v39, %v936_v60 }
 0x2fb   : > { %v506_v38 = vsub.f32 %v500_v33, %v504_v40  ;;  %v513_v43 = vmax.f32 %v511_v37, %v512_v41 }
 0x2fc   : > { %v507_v44 = vsub.f32 %v501_v34, %v505_v42 }
 0x2fd   : > { %v508_v15 = vadd.f32 %v506_v38, %v933_v56   ;;  %v514_v45 = vrot.slane %v513_v43, 2 }
 0x2fe   : > { %v509_v14 = vadd.f32 %v507_v44, %v936_v60  }
 0x2ff   : > { %v515_v46 = vmax.f32 %v513_v43, %v514_v45 }
 0x301   : > { %v516_v47 = vrot.slane %v515_v46, 1 }
 0x303   : > { %v517_v48 = vmax.f32 %v515_v46, %v516_v47 }
 0x305   : > { %vm518_vm9 = vcmp.ge.f32.partialorder %v517_v48, 15.0 }
 0x306   : > { %vm523_vm10 = vmand %vm522_vm1, %vm518_vm9 }
 0x307   : > { %v525_v51 = vsel %vm523_vm10, %v524_v50, %v466_v2  }
 0x308   : > { %44 = vmin.xlane.f32.xlu0 %v525_v51  ;;  %v974_v3 = vmov %v525_v51 }
 0x391   : > { %v45_v52 = vpop.xlane.xlu0 %44 }
 0x392   : > { %568 = vpush %v45_v52 }
 0x3c3   : > { %s569_s11 = spop %568 }
 0x3c4   : > { %p47_p7 = scmp.lt.f32.partialorder %s569_s11, 0.0 }
 0x3c6   : > { %p48_p8 = pnand %p47_p7, %p43_p6 }
 0x3c7   :  { %v976_v13 = vmov (%p48_p8), %v525_v51 }
 0x3c8   :  { %51 = sbr.rel (!%p48_p8) target bundleno = 215 (0xd7), region = 35 }
 0x3cd PF:  { %vm527_vm11 = vcmp.lt.f32.partialorder %v761_v13, 0.0  ;;  %s767_s12 = smov [#allocation5]   ;;  %v761_v13 = vphi %v973_v13, %v976_v13  }
 0x3ce   :  { %v528_v53 = vsel %vm527_vm11, 2000.0, %v761_v13  ;;  %s536_s0 = sshll.u32 %s767_s12, 4  ;;  %s537_s0 = int_to_ptr.vmem [resolvable:$true] %s536_s0 }
 0x3cf   :  { %529 = vst [vmem:[#allocation5] sm:$0x1] %v528_v53  ;;  %s699_s14 = scalar_lea.vmem %s537_s0, 16  ;;  %s703_s15 = scalar_lea.vmem %s537_s0, 32 }
 0x3d0   :  { %p700_p9 = scmp.ne.s32.totalorder %s537_s0, %s699_s14  ;;  %p704_p10 = scmp.lt.s32.totalorder %s537_s0, %s537_s0 }
 0x3d1   :  { %p705_p11 = scmp.lt.s32.totalorder %s703_s15, %s699_s14 }
 0x3d3   :  { %p706_p12 = por %p705_p11, %p704_p10 }
 0x3d5   :  { %p707_p13 = pnand %p706_p12, %p700_p9 }
 0x3d7   :  { %710 = shalt.err (!%p707_p13)
}
 0x3d8   :  { %539 = dma.vmem_to_hbm [thread:$0]  %s537_s0, 16, %s972_s1, [#allocation4]  }
 0x3d9   :  { %741 = dma.done.wait [#allocation4], 16  }
 0x3da   :  { %742 = vsyncadd [#allocation4], 4294967280 }
 0x3db   :  { %543 = vsyncpa [#allocation3], 1 }
 0x3dc   :  { %544 = vsyncpa [#allocation4], 1 }

</bundles_post_ra>
